<compile_context>
chip_gen: v7x
topology: tpu7x:2x2x1
jax: 0.10.0
libtpu: 0.0.40
codegen_flags: <defaults>
</compile_context>

<pallas_src>
import math
import functools

import jax
import jax.numpy as jnp
from jax.experimental import pallas as pl
from jax.experimental.pallas import tpu as pltpu

POPULATION_SIZE = 100  # hard-coded in the PyTorch module


def _round_up(n, m):
    return ((n + m - 1) // m) * m


# ----------------------------------------------------------------------------- kernel
def _sel_kernel(bs, outdim, n_graph_rows, n_f_rows, E, H, XW, wcat_off,
                bfsum_ref, fact_ref, wslab_ref, vslab_ref, out_ref):
    f32 = jnp.float32

    # Packed weights (static slices of the VMEM-resident slabs).
    We   = wslab_ref[0:POPULATION_SIZE, 0:E]           # (100, E)  bf16   fused encoder
    Wcat = wslab_ref[wcat_off:wcat_off + XW, 0:H]       # (XW, H)   bf16   fused post-pooling

    be   = vslab_ref[0:1, 0:E]                          # fused encoder bias        (f32)
    bgd  = vslab_ref[1:2, 0:H]                          # (bg @ wd1)
    bfd  = vslab_ref[2:3, 0:H]                          # (bf @ wd1)
    bd1  = vslab_ref[3:4, 0:H]                          # decoder[0] bias
    wd2  = vslab_ref[4:5, 0:H]                          # decoder[2] weight (transposed)
    bd2  = vslab_ref[5:6, 0:1]                          # decoder[2] bias

    # --- encoder (3 fused linears): ONE MXU matmul over all (b, outdim) rows ----------
    h = jnp.dot(fact_ref[...], We, preferred_element_type=f32) + be   # (bs*outdim, E) f32
    h3 = h.reshape(bs, outdim, E)
    maxp  = jnp.max(h3, axis=1)                                       # (bs, E)
    hmean = jnp.sum(h3, axis=1) * (1.0 / outdim)                      # (bs, E)

    # --- fused post-pooling matmul (graph/f embeds + both projections + decoder[0]) ---
    X = jnp.concatenate([bfsum_ref[...], maxp, hmean], axis=-1)       # (bs, XW) f32
    d1 = jnp.dot(X.astype(jnp.bfloat16), Wcat, preferred_element_type=f32)   # (bs, H)
    bcat = float(n_graph_rows) * bgd + float(n_f_rows) * bfd + bd1
    d1 = jnp.maximum(d1 + bcat, 0.0)                                  # ReLU

    # --- decoder[2]: (H -> 1) as a VPU/XLU dot product ---------------------------------
    out_ref[...] = jnp.sum(d1 * wd2, axis=-1, keepdims=True) + bd2    # (bs, 1)


# ----------------------------------------------------------------------------- packing
def init_params(key, embedding_dim, hidden_dim, num_obj):
    """Deterministic parameter init (PyTorch-Linear-style uniform)."""
    E, H = embedding_dim, hidden_dim

    def linear(k, fin, fout, bias=True):
        kw, kb = jax.random.split(k)
        s = 1.0 / math.sqrt(fin)
        w = jax.random.uniform(kw, (fin, fout), jnp.float32, -s, s)
        b = jax.random.uniform(kb, (1, fout), jnp.float32, -s, s) if bias else None
        return w, b

    keys = jax.random.split(key, 11)
    p = {}
    p['wg1'], p['bg1'] = linear(keys[0], 2, E)                 # graph_embedder[0]
    p['wg2'], p['bg2'] = linear(keys[1], E, E)                 # graph_embedder[1]
    p['wf1'], p['bf1'] = linear(keys[2], num_obj, E)           # embedderf[0]
    p['wf2'], p['bf2'] = linear(keys[3], E, E)                 # embedderf[1]
    p['we1'], p['be1'] = linear(keys[4], POPULATION_SIZE, E)   # encoder[0]
    p['we2'], p['be2'] = linear(keys[5], E, E)                 # encoder[1]
    p['we3'], p['be3'] = linear(keys[6], E, E)                 # encoder[2]
    p['wpg'], _ = linear(keys[7], E, E, bias=False)            # project_graph
    p['wpn'], _ = linear(keys[8], E, E, bias=False)            # project_node
    p['wd1'], p['bd1'] = linear(keys[9], E, H)                 # decoder[0]
    p['wd2'], p['bd2'] = linear(keys[10], H, 1)                # decoder[2]
    return p


def _fuse_and_pack(params):
    """Pre-compose all activation-free linear chains (incl. through decoder[0]) and
    pack them into a bf16 weight slab + a small f32 vector slab.  Runs once at init."""
    hi = jax.lax.Precision.HIGHEST
    dot = lambda a, b: jnp.dot(a, b, precision=hi)

    E = params['wg2'].shape[1]
    H = params['wd1'].shape[1]
    num_obj = params['wf1'].shape[0]
    wd1 = params['wd1']

    # fused plain chains
    Wg = dot(params['wg1'], params['wg2'])
    bg = dot(params['bg1'], params['wg2']) + params['bg2']
    Wf = dot(params['wf1'], params['wf2'])
    bf = dot(params['bf1'], params['wf2']) + params['bf2']
    We = dot(dot(params['we1'], params['we2']), params['we3'])
    be = dot(dot(params['be1'], params['we2']) + params['be2'], params['we3']) + params['be3']

    # pre-compose through decoder[0] (exact: chain is linear up to the ReLU)
    Wgd  = dot(Wg, wd1)             # (2, H)
    Wfd  = dot(Wf, wd1)             # (num_obj, H)
    Wpgd = dot(params['wpg'], wd1)  # (E, H)   project_graph @ wd1
    Wpnd = dot(params['wpn'], wd1)  # (E, H)   project_node  @ wd1
    bgd  = dot(bg, wd1)             # (1, H)
    bfd  = dot(bf, wd1)             # (1, H)

    BFW = _round_up(2 + num_obj, 8)                     # width of the [bsum|fsum] segment
    XW = BFW + 2 * E                                    # width of the fused X operand
    Wcat = jnp.concatenate(
        [Wgd, Wfd, jnp.zeros((BFW - (2 + num_obj), H), jnp.float32), Wpgd, Wpnd], axis=0)

    C = max(E, H)
    WE_ROWS = _round_up(POPULATION_SIZE, 16)            # bf16 sublane-aligned segment start
    WCAT_ROWS = _round_up(XW, 16)

    def padto(a, rows, cols):
        return jnp.pad(a, ((0, rows - a.shape[0]), (0, cols - a.shape[1])))

    wslab = jnp.concatenate([padto(We, WE_ROWS, C), padto(Wcat, WCAT_ROWS, C)],
                            axis=0).astype(jnp.bfloat16)                      # bf16 MXU weights

    vslab = jnp.concatenate([padto(be, 1, C), padto(bgd, 1, C), padto(bfd, 1, C),
                             padto(params['bd1'], 1, C), padto(params['wd2'].T, 1, C),
                             padto(params['bd2'], 1, C),
                             jnp.zeros((2, C), jnp.float32)], axis=0)          # (8, C) f32

    meta = dict(E=E, H=H, num_obj=num_obj, BFW=BFW, XW=XW, wcat_off=WE_ROWS)
    return wslab, vslab, meta


# ----------------------------------------------------------------------------- forward
def _forward(wslab, vslab, batch, f, vec, *, E, H, num_obj, BFW, XW, wcat_off):
    bs, num, _ = f.shape
    outdim = vec.shape[-1]
    n_graph_rows = math.prod(batch.shape[1:-1])

    # wrapper-side (fused under jit) tiny reductions: drop batch/f as kernel operands.
    bsum = jnp.sum(batch.reshape(bs, -1, batch.shape[-1]).astype(jnp.float32), axis=1)  # (bs, 2)
    fsum = jnp.sum(f.astype(jnp.float32), axis=1)                                       # (bs, no)
    bfsum = jnp.pad(jnp.concatenate([bsum, fsum], axis=-1),
                    ((0, 0), (0, BFW - (2 + num_obj))))                                 # (bs, BFW)

    fact2d = jnp.swapaxes(vec, 1, -1).reshape(
        bs * outdim, POPULATION_SIZE).astype(jnp.bfloat16)                              # (bs*od,100)

    kernel = functools.partial(_sel_kernel, bs, outdim, n_graph_rows, num,
                               E, H, XW, wcat_off)
    ans = pl.pallas_call(
        kernel,
        out_shape=jax.ShapeDtypeStruct((bs, 1), jnp.float32),
        in_specs=[pl.BlockSpec(memory_space=pltpu.MemorySpace.VMEM)] * 4,
        out_specs=pl.BlockSpec(memory_space=pltpu.MemorySpace.VMEM),
    )(bfsum, fact2d, wslab, vslab)
    return ans.squeeze()


class SelBaselinePallas:
    """Packs/fuses parameters once; jits the whole forward path."""

    def __init__(self, params):
        self.wslab, self.vslab, meta = _fuse_and_pack(params)
        self._fwd = jax.jit(functools.partial(_forward, **meta))

    def __call__(self, batch, f, vec):
        ans = self._fwd(self.wslab, self.vslab, batch, f, vec)
        # .detach() has no effect on the forward value; stop_gradient is the JAX analogue.
        return jax.lax.stop_gradient(ans), ans


# ----------------------------------------------------------------------------- reference
def reference_forward(params, batch, f, vec):
    """Pure-JAX mirror of the PyTorch forward (unfused, highest precision)."""
    hi = jax.lax.Precision.HIGHEST

    def lin(x, w, b=None):
        y = jnp.dot(x, w, precision=hi, preferred_element_type=jnp.float32)
        return y + b if b is not None else y

    f_act = jnp.swapaxes(vec, 1, -1)
    ge = lin(lin(batch, params['wg1'], params['bg1']), params['wg2'], params['bg2'])
    graph_embed = ge.sum(axis=1).sum(axis=1)[:, None, :]
    fe = lin(lin(f, params['wf1'], params['bf1']), params['wf2'], params['bf2'])
    f_embed = fe.sum(axis=1)[:, None, :]
    h = lin(lin(lin(f_act, params['we1'], params['be1']),
                params['we2'], params['be2']), params['we3'], params['be3'])
    maxp = h.max(axis=1)
    gf = lin(maxp, params['wpg'])[:, None, :]
    nf = lin(h, params['wpn'])
    fusion = nf + gf + graph_embed + f_embed
    m = fusion.mean(axis=1)
    d1 = jnp.maximum(lin(m, params['wd1'], params['bd1']), 0.0)
    ans = lin(d1, params['wd2'], params['bd2'])
    return ans.squeeze()


# ----------------------------------------------------------------------------- main
if __name__ == "__main__":
    embedding_dim = 32
    hidden_dim = 32
    num_obj = 3
    bs, A, B = 2, 4, 16      # batch: (bs, A, B, 2) TSP-like coordinates
    num = 8                  # number of objective vectors in f
    outdim = 8               # vec.size(-1)

    key = jax.random.PRNGKey(0)
    k_param, k_batch, k_f, k_vec = jax.random.split(key, 4)

    params = init_params(k_param, embedding_dim, hidden_dim, num_obj)
    batch = jax.random.uniform(k_batch, (bs, A, B, 2), jnp.float32)
    f = jax.random.uniform(k_f, (bs, num, num_obj), jnp.float32)
    vec = jax.random.uniform(k_vec, (bs, POPULATION_SIZE, outdim), jnp.float32)

    model = SelBaselinePallas(params)          # fuse + pack once
    ans_detached, ans = model(batch, f, vec)   # jitted path (pallas_call inside)
    jax.block_until_ready(ans)

    ref = reference_forward(params, batch, f, vec)
    err = jnp.max(jnp.abs(ans - ref))
    scale = 1.0 + jnp.max(jnp.abs(ref))
    assert float(err) < 2e-2 * float(scale), f"mismatch: max abs err {err}"

    print("KERNEL_OK")
</pallas_src>

<mosaic_0001>
module attributes {stable_mosaic.version = 11 : i64} {
  func.func @_sel_kernel(%arg0: memref<2x8xf32, #tpu.memory_space<vmem>>, %arg1: memref<16x100xbf16, #tpu.memory_space<vmem>>, %arg2: memref<192x32xbf16, #tpu.memory_space<vmem>>, %arg3: memref<8x32xf32, #tpu.memory_space<vmem>>, %arg4: memref<2x1xf32, #tpu.memory_space<vmem>>) attributes {dimension_semantics = [], scalar_prefetch = 0 : i64, scratch_operands = 0 : i64, tpu.core_type = #tpu.core_type<tc>} {
    %c0 = arith.constant 0 : index
    %c0_0 = arith.constant 0 : index
    %0 = vector.load %arg2[%c0, %c0_0] : memref<192x32xbf16, #tpu.memory_space<vmem>>, vector<100x32xbf16>
    %c112 = arith.constant 112 : index
    %c0_1 = arith.constant 0 : index
    %1 = vector.load %arg2[%c112, %c0_1] : memref<192x32xbf16, #tpu.memory_space<vmem>>, vector<72x32xbf16>
    %c0_2 = arith.constant 0 : index
    %c0_3 = arith.constant 0 : index
    %2 = vector.load %arg3[%c0_2, %c0_3] : memref<8x32xf32, #tpu.memory_space<vmem>>, vector<1x32xf32>
    %c1 = arith.constant 1 : index
    %c0_4 = arith.constant 0 : index
    %3 = vector.load %arg3[%c1, %c0_4] : memref<8x32xf32, #tpu.memory_space<vmem>>, vector<1x32xf32>
    %c2 = arith.constant 2 : index
    %c0_5 = arith.constant 0 : index
    %4 = vector.load %arg3[%c2, %c0_5] : memref<8x32xf32, #tpu.memory_space<vmem>>, vector<1x32xf32>
    %c3 = arith.constant 3 : index
    %c0_6 = arith.constant 0 : index
    %5 = vector.load %arg3[%c3, %c0_6] : memref<8x32xf32, #tpu.memory_space<vmem>>, vector<1x32xf32>
    %c4 = arith.constant 4 : index
    %c0_7 = arith.constant 0 : index
    %6 = vector.load %arg3[%c4, %c0_7] : memref<8x32xf32, #tpu.memory_space<vmem>>, vector<1x32xf32>
    %c5 = arith.constant 5 : index
    %c0_8 = arith.constant 0 : index
    %7 = vector.load %arg3[%c5, %c0_8] : memref<8x32xf32, #tpu.memory_space<vmem>>, vector<1x1xf32>
    %c0_9 = arith.constant 0 : index
    %c0_10 = arith.constant 0 : index
    %8 = vector.load %arg1[%c0_9, %c0_10] : memref<16x100xbf16, #tpu.memory_space<vmem>>, vector<16x100xbf16>
    %cst = arith.constant dense<0.000000e+00> : vector<16x32xf32>
    %9 = tpu.matmul %8, %0, %cst {dimension_numbers = #tpu.dot_dimension_numbers<[1], [0], [0], [1], [0, 0, 1, 1], [], []>} : vector<16x100xbf16>, vector<100x32xbf16>, vector<16x32xf32> -> vector<16x32xf32>
    %10 = vector.broadcast %2 : vector<1x32xf32> to vector<16x32xf32>
    %11 = arith.addf %9, %10 : vector<16x32xf32>
    %12 = vector.shape_cast %11 : vector<16x32xf32> to vector<2x8x32xf32>
    %cst_11 = arith.constant dense<0xFF800000> : vector<2x32xf32>
    %13 = vector.multi_reduction <maximumf>, %12, %cst_11 [1] : vector<2x8x32xf32> to vector<2x32xf32>
    %cst_12 = arith.constant dense<0.000000e+00> : vector<2x32xf32>
    %14 = vector.multi_reduction <add>, %12, %cst_12 [1] : vector<2x8x32xf32> to vector<2x32xf32>
    %cst_13 = arith.constant 1.250000e-01 : f32
    %15 = vector.broadcast %cst_13 : f32 to vector<2x32xf32>
    %16 = arith.mulf %14, %15 : vector<2x32xf32>
    %c0_14 = arith.constant 0 : index
    %c0_15 = arith.constant 0 : index
    %17 = vector.load %arg0[%c0_14, %c0_15] : memref<2x8xf32, #tpu.memory_space<vmem>>, vector<2x8xf32>
    %18 = tpu.concatenate %17, %13, %16 in 1 : vector<2x8xf32>, vector<2x32xf32>, vector<2x32xf32> -> vector<2x72xf32>
    %19 = arith.truncf %18 : vector<2x72xf32> to vector<2x72xbf16>
    %cst_16 = arith.constant dense<0.000000e+00> : vector<2x32xf32>
    %20 = tpu.matmul %19, %1, %cst_16 {dimension_numbers = #tpu.dot_dimension_numbers<[1], [0], [0], [1], [0, 0, 1, 1], [], []>} : vector<2x72xbf16>, vector<72x32xbf16>, vector<2x32xf32> -> vector<2x32xf32>
    %cst_17 = arith.constant 6.400000e+01 : f32
    %21 = vector.broadcast %cst_17 : f32 to vector<1x32xf32>
    %22 = arith.mulf %21, %3 : vector<1x32xf32>
    %cst_18 = arith.constant 8.000000e+00 : f32
    %23 = vector.broadcast %cst_18 : f32 to vector<1x32xf32>
    %24 = arith.mulf %23, %4 : vector<1x32xf32>
    %25 = arith.addf %22, %24 : vector<1x32xf32>
    %26 = arith.addf %25, %5 : vector<1x32xf32>
    %27 = vector.broadcast %26 : vector<1x32xf32> to vector<2x32xf32>
    %28 = arith.addf %20, %27 : vector<2x32xf32>
    %cst_19 = arith.constant 0.000000e+00 : f32
    %29 = vector.broadcast %cst_19 : f32 to vector<2x32xf32>
    %30 = arith.maximumf %28, %29 : vector<2x32xf32>
    %31 = vector.broadcast %6 : vector<1x32xf32> to vector<2x32xf32>
    %32 = arith.mulf %30, %31 : vector<2x32xf32>
    %cst_20 = arith.constant dense<0.000000e+00> : vector<2xf32>
    %33 = vector.multi_reduction <add>, %32, %cst_20 [1] : vector<2x32xf32> to vector<2xf32>
    %34 = vector.shape_cast %33 : vector<2xf32> to vector<2x1xf32>
    %35 = vector.broadcast %7 : vector<1x1xf32> to vector<2x1xf32>
    %36 = arith.addf %34, %35 : vector<2x1xf32>
    %c0_21 = arith.constant 0 : index
    %c0_22 = arith.constant 0 : index
    %37 = vector.load %arg4[%c0_21, %c0_22] : memref<2x1xf32, #tpu.memory_space<vmem>>, vector<2x1xf32>
    tpu.vector_store %arg4[%c0_21, %c0_22], %36 {strides = array<i32>} : memref<2x1xf32, #tpu.memory_space<vmem>>, vector<2x1xf32>,
    return
  }
}

</mosaic_0001>

<bundles_post_ra>
// kernel: _forward.1
= control target key start
LH: loop header
LB: loop body
LE: loop exit
PB: predicated region body
PF: predicated region fallthrough
CT: control target
= control target key end

     0   :  { %v380_v0 = vmov 0.0   ;;  %vm381_vm0 = vmmov 0   ;;  %vm100_vm1 = vcmask 1041408   ;;  %vm96_vm2 = vcmask 818176   ;;  %s383_s16 = smov 40   ;;  %s472_s2 = inlined_call_operand.vmem [shape: bf16[192,32], index: 2, kind: input, shape index: {}]   ;;  %s473_s1 = inlined_call_operand.vmem [shape: bf16[16,100], index: 1, kind: input, shape index: {}]   ;;  %s474_s3 = inlined_call_operand.vmem [shape: f32[8,32], index: 3, kind: input, shape index: {}]   ;;  %s475_s0 = inlined_call_operand.vmem [shape: f32[2,8], index: 0, kind: input, shape index: {}]   ;;  %s476_s4 = inlined_call_operand.vmem [shape: f32[2,1], index: 4, kind: output, shape index: {}]  }
   0x1   :  { %331 = vmatprep.subr.bf16.mxu0 %v380_v0  ;;  %v367_v1 = vld [vmem:[%s472_s2] sm:$0xff]   ;;  %345 = vmatprep.mubr.msk.bf16.mxu0 %vm381_vm0, %v380_v0  ;;  %v368_v2 = vld [vmem:[%s472_s2 + $0x8] sm:$0xff]   ;;  %v369_v3 = vld [vmem:[%s472_s2 + $0x10] sm:$0xff]   ;;  %vm145_vm3 = vcmask 261120   ;;  %vm234_vm4 = vcmask 1043456   ;;  %vm179_vm5 = vcmask 1041409  }
   0x2   :  { %349 = vmatprep.subr.bf16.mxu1 %v380_v0  ;;  %359 = vmatprep.mubr.msk.bf16.mxu1 %vm381_vm0, %v380_v0  ;;  %v370_v4 = vld [vmem:[%s472_s2 + $0x18] sm:$0xff]   ;;  %v371_v5 = vld [vmem:[%s472_s2 + $0x20] sm:$0xff]   ;;  %v372_v6 = vld [vmem:[%s472_s2 + $0x28] sm:$0xff]   ;;  %vm190_vm6 = vcmask 64512   ;;  %vm192_vm7 = vcmask 326656   ;;  %vm230_vm8 = vcmask 588800  }
   0x3   :  { %332 = vmatpush3.bf16.msra.mxu0 %v367_v1  ;;  %v373_v7 = vld [vmem:[%s472_s2 + $0x30] ss:$0 sps:$4 sm:$0x33]   ;;  %v374_v9 = vld [vmem:[%s473_s1] sm:$0xff]   ;;  %v375_v10 = vld [vmem:[%s472_s2 + $0x38] sm:$0xff]   ;;  %v199_v1 = vlaneseq  ;;  %vm284_vm9 = vcmask 254976  }
   0x4   :  { %333 = vmatprep.subr.bf16.mxu0 %v380_v0  ;;  %v102_v8 = vsel %vm100_vm1, %v373_v7, 0  ;;  %350 = vmatpush3.bf16.msra.mxu1 %v375_v10  ;;  %v376_v11 = vld [vmem:[%s472_s2 + $0x40] sm:$0xff]   ;;  %v377_v12 = vld [vmem:[%s472_s2 + $0x48] sm:$0xff]   ;;  %v378_v24 = vld [vmem:[%s472_s2 + $0x50] sm:$0xff]   ;;  %vm293_vm10 = vcmask 1024  }
   0x5   :  { %351 = vmatprep.subr.bf16.mxu1 %v380_v0  ;;  %v299_v13 = vld [vmem:[%s474_s3] ss:$0 sm:$0xff]  ;;  %v379_v31 = vld [vmem:[%s472_s2 + $0x58] ss:$0 sps:$4 sm:$0xff]   ;;  %s382_s2 = smov 8  }
   0x6   :  { %v236_v40 = vsel %vm234_vm4, %v379_v31, 0  ;;  %v176_v56 = vld [vmem:[%s475_s0] sm:$0x3]  ;;  %v42_v62 = vld [vmem:[%s474_s3 + $0x2] sm:$0x1] }
   0x7   :  { %334 = vmatpush3.bf16.msra.mxu0 %v368_v2  ;;  %v41_v61 = vld [vmem:[%s474_s3 + $0x1] sm:$0x1] }
   0x8   :  { %335 = vmatprep.subr.bf16.mxu0 %v380_v0  ;;  %352 = vmatpush3.bf16.msra.mxu1 %v376_v11  ;;  %v195_v63 = vmul.f32 64.0, %v41_v61 }
   0x9   :  { %353 = vmatprep.subr.bf16.mxu1 %v380_v0 }
   0xb   :  { %336 = vmatpush3.bf16.msra.mxu0 %v369_v3  ;;  %v200_v3 = vshrl.u32 %v199_v1, 7 }
   0xc   :  { %337 = vmatprep.subr.bf16.mxu0 %v380_v0  ;;  %354 = vmatpush3.bf16.msra.mxu1 %v377_v12  ;;  %v315_v12 = vld [vmem:[%s474_s3 + $0x4] ss:$0 sm:$0xff] }
   0xd   :  { %355 = vmatprep.subr.bf16.mxu1 %v380_v0 }
   0xf   :  { %338 = vmatpush3.bf16.msra.mxu0 %v370_v4  ;;  %v43_v4 = vld [vmem:[%s474_s3 + $0x3] sm:$0x1] }
  0x10   :  { %339 = vmatprep.subr.bf16.mxu0 %v380_v0  ;;  %356 = vmatpush3.bf16.msra.mxu1 %v378_v24 }
  0x11   :  { %357 = vmatprep.subr.bf16.mxu1 %v380_v0 }
  0x13   :  { %340 = vmatpush3.bf16.msra.mxu0 %v371_v5 }
  0x14   :  { %341 = vmatprep.subr.bf16.mxu0 %v380_v0  ;;  %358 = vmatpush3.bf16.msra.mxu1 %v236_v40 }
  0x17   :  { %342 = vmatpush3.bf16.msra.mxu0 %v372_v6  ;;  %v201_v6 = vsub.s32 0, %v200_v3 }
  0x18   :  { %343 = vmatprep.subr.bf16.mxu0 %v380_v0  ;;  %v196_v0 = vmul.f32 8.0, %v42_v62 }
  0x1a   :  { %v197_v2 = vadd.f32 %v196_v0, %v195_v63 }
  0x1b   :  { %344 = vmatpush3.bf16.msra.mxu0 %v102_v8 }
  0x1c   :  { %v198_v5 = vadd.f32 %v197_v2, %v43_v4 }
  0x1e   :  { %346 = vmatmul.mubr.msk.bf16.vlgmr.msra.gmra.mrb[0].mxu0 %vm96_vm2, %v374_v9  ;;  %v202_v7 = vrot.slane %v198_v5, %v201_v6 }
  0xf1   :  { %v138_v14 = vpop.f32.mrb[0].mxu0 }
  0xf2   :  { %v139_v15 = vadd.f32 %v299_v13, %v138_v14  ;;  %v347_v16 = vpop.f32.mrb[1].mxu0 }
  0xf3   :  { %v141_v17 = vpop.f32.mrb[2].mxu0 }
  0xf4   :  { %v146_v18 = vsel %vm145_vm3, %v139_v15, -inf  ;;  %v160_v19 = vsel %vm145_vm3, %v139_v15, 0.0  ;;  %v142_v20 = vadd.f32 %v299_v13, %v141_v17  ;;  %v348_v21 = vpop.f32.mrb[3].mxu0  ;;  %v316_v17 = vld [vmem:[%s474_s3 + $0x5] ss:$0 sm:$0xff] }
  0xf5   :  { %v147_v22 = vrot.slane %v146_v18, 4  ;;  %v161_v23 = vrot.slane %v160_v19, 4 }
  0xf6   :  { %v153_v25 = vsel %vm145_vm3, %v142_v20, -inf  ;;  %v167_v26 = vsel %vm145_vm3, %v142_v20, 0.0 }
  0xf7   :  { %v148_v27 = vmax.f32 %v146_v18, %v147_v22  ;;  %v162_v28 = vadd.f32 %v161_v23, %v160_v19  ;;  %v154_v29 = vrot.slane %v153_v25, 4  ;;  %v168_v30 = vrot.slane %v167_v26, 4 }
  0xf9   :  { %v149_v32 = vrot.slane %v148_v27, 2  ;;  %v163_v33 = vrot.slane %v162_v28, 2  ;;  %v155_v34 = vmax.f32 %v153_v25, %v154_v29  ;;  %v169_v35 = vadd.f32 %v168_v30, %v167_v26 }
  0xfb   :  { %v150_v36 = vmax.f32 %v148_v27, %v149_v32  ;;  %v164_v37 = vadd.f32 %v163_v33, %v162_v28  ;;  %v156_v38 = vrot.slane %v155_v34, 2  ;;  %v170_v39 = vrot.slane %v169_v35, 2 }
  0xfd   :  { %v165_v41 = vrot.slane %v164_v37, 1  ;;  %v157_v42 = vmax.f32 %v155_v34, %v156_v38  ;;  %v171_v43 = vadd.f32 %v170_v39, %v169_v35  ;;  %v151_v44 = vrot.slane %v150_v36, 1 }
  0xff   :  { %v172_v45 = vrot.slane %v171_v43, 1  ;;  %v158_v46 = vrot.slane %v157_v42, 1  ;;  %v166_v47 = vadd.f32 %v165_v41, %v164_v37  ;;  %v152_v48 = vmax.f32 %v150_v36, %v151_v44 }
 0x101   :  { %v159_v49 = vmax.f32 %v157_v42, %v158_v46  ;;  %v173_v50 = vadd.f32 %v172_v45, %v171_v43  ;;  %v174_v52 = vmul.f32 0.125, %v166_v47 }
 0x103   :  { %v180_v51 = vsel %vm179_vm5, %v159_v49, %v152_v48  ;;  %v175_v53 = vmul.f32 0.125, %v173_v50 }
 0x104   :  { %181 = vrot.lane.b32.xlu0 %v180_v51, %s382_s2 }
 0x105   :  { %v186_v54 = vsel %vm179_vm5, %v175_v53, %v174_v52 }
 0x108   :  { %187 = vrot.lane.b32.xlu0 %v186_v54, %s383_s16 }
 0x176   :  { %v182_v55 = vpop.permute.xlu0 %181 }
 0x177   :  { %v191_v57 = vsel %vm190_vm6, %v176_v56, %v182_v55 }
 0x17a   :  { %v188_v58 = vpop.permute.xlu0 %187 }
 0x17b   :  { %v193_v59 = vsel %vm192_vm7, %v191_v57, %v188_v58 }
 0x17c   :  { %v194_v60 = vpack.c.bf16 %v193_v59, %v193_v59 }
 0x17e   :  { %360 = vmatmul.mubr.msk.bf16.vlgmr.msra.gmra.mrb[0].mxu1 %vm230_vm8, %v194_v60 }
 0x251   :  { %v272_v8 = vpop.f32.mrb[0].mxu1 }
 0x252   :  { %v273_v9 = vadd.f32 %v272_v8, %v202_v7  ;;  %v361_v10 = vpop.f32.mrb[1].mxu1 }
 0x253   :  { %v275_v11 = vpop.f32.mrb[2].mxu1 }
 0x254   :  { %v278_v13 = vmax.f32 %v273_v9, 0.0  ;;  %v362_v14 = vpop.f32.mrb[3].mxu1 }
 0x256   :  { %v283_v15 = vmul.f32 %v315_v12, %v278_v13 }
 0x258   :  { %v285_v16 = vsel %vm284_vm9, %v283_v15, 0.0 }
 0x259   :  { %286 = vadd.xlane.f32.xlu1 %v285_v16 }
 0x2e6   :  { %v287_v18 = vpop.xlane.xlu1 %286 }
 0x2e7   :  { %v292_v19 = vadd.f32 %v316_v17, %v287_v18 }
 0x2e9   :  { %294 = vst.msk [vmem:[%s476_s4] sm:$0x3] %vm293_vm10, %v292_v19 }

</bundles_post_ra>
